<compile_context>
chip_gen: v5e
topology: v5e:2x2
jax: 0.10.0
libtpu: 0.0.40
codegen_flags: <defaults>
</compile_context>

<pallas_src>
import math
import jax
import jax.numpy as jnp
from jax.experimental import pallas as pl
from jax.experimental.pallas import tpu as pltpu


def _gelu_tanh(x):
    # GELU with tanh approximation (matches nn.GELU(approximate='tanh')).
    # tanh lowers to the EUP -> essentially free once the kernel is MXU-bound.
    c = math.sqrt(2.0 / math.pi)
    return 0.5 * x * (1.0 + jnp.tanh(c * (x + 0.044715 * x * x * x)))


def mlp_kernel(x_ref, w1_ref, b1_ref, w2_ref, b2_ref, o_ref, acc_ref):
    # x_ref : (tm, C)  bf16        w1_ref: (C, th) bf16   b1_ref: (1, th) f32
    # w2_ref: (th, C)  bf16        b2_ref: (1, C)  f32
    # o_ref : (tm, C)  out dtype   acc_ref: (tm, C) f32 scratch (lives across j)
    j = pl.program_id(1)

    @pl.when(j == 0)
    def _():
        acc_ref[...] = jnp.zeros_like(acc_ref)

    # (tm, C) @ (C, th) -> (tm, th), f32 accumulate on the MXU.
    h = jnp.dot(x_ref[...], w1_ref[...], preferred_element_type=jnp.float32)
    h = _gelu_tanh(h + b1_ref[...])

    # Accumulate this hidden slice: (tm, th) @ (th, C) -> (tm, C).
    acc_ref[...] += jnp.dot(h.astype(w2_ref.dtype), w2_ref[...],
                            preferred_element_type=jnp.float32)

    @pl.when(j == pl.num_programs(1) - 1)
    def _():
        o_ref[...] = (acc_ref[...] + b2_ref[...]).astype(o_ref.dtype)


def _round_up(x, m):
    return (x + m - 1) // m * m


def _vmem_need_bytes(tm, th, C, out_itemsize):
    """Approximate VMEM footprint of one pipelined grid step (2x buffering)."""
    bf16 = 2
    nbuf = 2
    need = nbuf * tm * C * bf16            # x tile
    need += nbuf * C * th * bf16           # W_fc  hidden-slice
    need += nbuf * th * C * bf16           # W_proj hidden-slice
    need += nbuf * 8 * th * 4              # b_fc   (sublane-padded f32)
    need += nbuf * 8 * C * 4               # b_proj (sublane-padded f32)
    need += nbuf * tm * C * out_itemsize   # out tile
    need += tm * C * 4                     # f32 accumulator scratch
    return need


def _choose_tm(M, tm_target):
    """Row tile: multiples of 256 (MXU-friendly), minimal padding, capped."""
    if M <= 256:
        return _round_up(M, 16)            # tiny M: bf16 sublane packing, no big pad
    best_tm, best_pad = 256, _round_up(M, 256) - M
    t = 256
    while t <= tm_target:
        pad = _round_up(M, t) - M
        if pad <= best_pad:                # prefer larger tm on ties
            best_tm, best_pad = t, pad
        t += 256
    return best_tm


def _choose_th(H, C, tm, th_target, out_itemsize, vmem_budget):
    """Hidden tile: full H if the weights fit VMEM (-> fetched once for the
    whole grid), else the largest multiple of 128 dividing H within budget."""
    if _vmem_need_bytes(tm, H, C, out_itemsize) <= vmem_budget:
        return H
    best = None
    k = 128
    cap = min(th_target, H)
    while k <= cap:
        if H % k == 0 and _vmem_need_bytes(tm, k, C, out_itemsize) <= vmem_budget:
            best = k
        k += 128
    if best is None:
        best = 128 if H % 128 == 0 else H   # last resort
    return best


def mlp_forward(x, w_fc, b_fc, w_proj, b_proj, *, tm=512, th=2048,
                vmem_budget_bytes=40 * 1024 * 1024):
    """x: (B, T, C). w_fc: (C, 4C), b_fc: (4C,), w_proj: (4C, C), b_proj: (C,).

    Weights are stored (in, out), i.e. already transposed vs. nn.Linear.weight,
    so the kernel computes x @ W + b (== PyTorch x @ W.T + b).
    """
    B, T, C = x.shape
    H = w_fc.shape[1]
    M = B * T
    out_itemsize = jnp.dtype(x.dtype).itemsize

    # --- tile selection ------------------------------------------------------
    tm = _choose_tm(M, tm)
    th = _choose_th(H, C, tm, th, out_itemsize, vmem_budget_bytes)
    M_pad = _round_up(M, tm)

    # Honest VMEM limit: actual need + slack, never the full v7x 64 MiB.
    need = _vmem_need_bytes(tm, th, C, out_itemsize)
    vmem_limit_bytes = int(min(56 * 1024 * 1024,
                               max(need + 4 * 1024 * 1024, 16 * 1024 * 1024)))

    # --- operand prep (bf16 MXU inputs, f32 biases) --------------------------
    x2d = x.reshape(M, C).astype(jnp.bfloat16)
    if M_pad != M:
        x2d = jnp.pad(x2d, ((0, M_pad - M), (0, 0)))
    w1 = w_fc.astype(jnp.bfloat16)
    w2 = w_proj.astype(jnp.bfloat16)
    b1 = b_fc.reshape(1, H).astype(jnp.float32)
    b2 = b_proj.reshape(1, C).astype(jnp.float32)

    n_i = M_pad // tm
    n_j = H // th
    grid = (n_i, n_j)

    # Real DMA traffic: when th == H the weight index_maps are constant across
    # the grid so Pallas fetches them once; otherwise they re-stream per i tile.
    weight_stream = 1 if th == H else n_i
    cost = pl.CostEstimate(
        flops=4 * M_pad * C * H,                    # two matmuls
        transcendentals=M_pad * H,                  # tanh in GELU
        bytes_accessed=(x2d.size * 2
                        + (w1.size * 2 + w2.size * 2) * weight_stream
                        + b1.size * 4 + b2.size * 4
                        + M_pad * C * out_itemsize),
    )

    # TODO(synk): emit bf16 output (out_shape dtype) if downstream accepts it;
    # keeping x.dtype here to match the PyTorch module's dtype semantics.
    out = pl.pallas_call(
        mlp_kernel,
        out_shape=jax.ShapeDtypeStruct((M_pad, C), x.dtype),
        grid_spec=pltpu.PrefetchScalarGridSpec(
            num_scalar_prefetch=0,
            grid=grid,
            in_specs=[
                pl.BlockSpec((tm, C), lambda i, j: (i, 0)),   # x rows
                pl.BlockSpec((C, th), lambda i, j: (0, j)),   # W_fc   H-slice
                pl.BlockSpec((1, th), lambda i, j: (0, j)),   # b_fc   H-slice
                pl.BlockSpec((th, C), lambda i, j: (j, 0)),   # W_proj H-slice
                pl.BlockSpec((1, C), lambda i, j: (0, 0)),    # b_proj
            ],
            out_specs=pl.BlockSpec((tm, C), lambda i, j: (i, 0)),
            scratch_shapes=[pltpu.VMEM((tm, C), jnp.float32)],  # f32 accumulator
        ),
        compiler_params=pltpu.CompilerParams(
            dimension_semantics=("parallel", "arbitrary"),
            vmem_limit_bytes=vmem_limit_bytes),
        cost_estimate=cost,
    )(x2d, w1, b1, w2, b2)

    if M_pad != M:
        out = out[:M]
    return out.reshape(B, T, C)


def reference_mlp(x, w_fc, b_fc, w_proj, b_proj):
    h = jnp.einsum("btc,ch->bth", x, w_fc) + b_fc
    h = _gelu_tanh(h)
    return jnp.einsum("bth,hc->btc", h, w_proj) + b_proj


if __name__ == "__main__":
    # Small config consistent with the module (hidden = 4 * n_embd); C is a
    # multiple of 128 so the output stores are lane-dense.
    B, T, C = 2, 8, 128
    H = 4 * C

    key = jax.random.PRNGKey(0)
    kx, k1, k2, k3, k4 = jax.random.split(key, 5)

    x = jax.random.normal(kx, (B, T, C), dtype=jnp.float32)

    # nn.Linear-style init (uniform +/- 1/sqrt(fan_in)), stored (in, out).
    bound_fc = 1.0 / math.sqrt(C)
    w_fc = jax.random.uniform(k1, (C, H), jnp.float32, -bound_fc, bound_fc)
    b_fc = jax.random.uniform(k2, (H,), jnp.float32, -bound_fc, bound_fc)

    bound_pj = 1.0 / math.sqrt(H)
    w_proj = jax.random.uniform(k3, (H, C), jnp.float32, -bound_pj, bound_pj)
    b_proj = jax.random.uniform(k4, (C,), jnp.float32, -bound_pj, bound_pj)

    out = mlp_forward(x, w_fc, b_fc, w_proj, b_proj)
    out = jax.block_until_ready(out)

    # Reference in f32 on bf16-rounded operands (kernel uses bf16 matmul inputs
    # with f32 accumulation); tolerance sized for bf16.
    ref = reference_mlp(
        x.astype(jnp.bfloat16).astype(jnp.float32),
        w_fc.astype(jnp.bfloat16).astype(jnp.float32), b_fc,
        w_proj.astype(jnp.bfloat16).astype(jnp.float32), b_proj)

    assert out.shape == (B, T, C)
    assert jnp.allclose(out, ref, atol=2e-2, rtol=2e-2), "mismatch vs reference"

    print("KERNEL_OK")
</pallas_src>

<mosaic_0001>
module attributes {stable_mosaic.version = 11 : i64} {
  func.func @mlp_kernel(%arg0: i32, %arg1: i32, %arg2: memref<16x128xbf16, #tpu.memory_space<vmem>>, %arg3: memref<128x512xbf16, #tpu.memory_space<vmem>>, %arg4: memref<1x512xf32, #tpu.memory_space<vmem>>, %arg5: memref<512x128xbf16, #tpu.memory_space<vmem>>, %arg6: memref<1x128xf32, #tpu.memory_space<vmem>>, %arg7: memref<16x128xf32, #tpu.memory_space<vmem>>, %arg8: memref<16x128xf32, #tpu.memory_space<vmem>>) attributes {dimension_semantics = [#tpu.dimension_semantics<parallel>, #tpu.dimension_semantics<arbitrary>], iteration_bounds = array<i64: 1, 1>, scalar_prefetch = 0 : i64, scratch_operands = 1 : i64, tpu.core_type = #tpu.core_type<tc>, window_params = [{transform_indices = @transform_0, window_bounds = array<i64: 16, 128>}, {transform_indices = @transform_1, window_bounds = array<i64: 128, 512>}, {transform_indices = @transform_2, window_bounds = array<i64: 1, 512>}, {transform_indices = @transform_3, window_bounds = array<i64: 512, 128>}, {pipeline_mode = #tpu.pipeline_mode<synchronous>, transform_indices = @transform_4, window_bounds = array<i64: 1, 128>}, {transform_indices = @transform_5, window_bounds = array<i64: 16, 128>}]} {
    %c0_i32 = arith.constant 0 : i32
    %0 = arith.cmpi eq, %arg1, %c0_i32 : i32
    %1 = arith.extui %0 : i1 to i32
    %c0_i32_0 = arith.constant 0 : i32
    %2 = arith.cmpi ne, %1, %c0_i32_0 : i32
    scf.if %2 {
      %cst_19 = arith.constant 0.000000e+00 : f32
      %31 = vector.broadcast %cst_19 : f32 to vector<16x128xf32>
      %c0_20 = arith.constant 0 : index
      %c0_21 = arith.constant 0 : index
      %32 = vector.load %arg8[%c0_20, %c0_21] : memref<16x128xf32, #tpu.memory_space<vmem>>, vector<16x128xf32>
      tpu.vector_store %arg8[%c0_20, %c0_21], %31 {strides = array<i32>} : memref<16x128xf32, #tpu.memory_space<vmem>>, vector<16x128xf32>,
    } else {
    }
    %c0 = arith.constant 0 : index
    %c0_1 = arith.constant 0 : index
    %3 = vector.load %arg2[%c0, %c0_1] : memref<16x128xbf16, #tpu.memory_space<vmem>>, vector<16x128xbf16>
    %c0_2 = arith.constant 0 : index
    %c0_3 = arith.constant 0 : index
    %4 = vector.load %arg3[%c0_2, %c0_3] : memref<128x512xbf16, #tpu.memory_space<vmem>>, vector<128x512xbf16>
    %cst = arith.constant dense<0.000000e+00> : vector<16x512xf32>
    %5 = tpu.matmul %3, %4, %cst {dimension_numbers = #tpu.dot_dimension_numbers<[1], [0], [0], [1], [0, 0, 1, 1], [], []>} : vector<16x128xbf16>, vector<128x512xbf16>, vector<16x512xf32> -> vector<16x512xf32>
    %c0_4 = arith.constant 0 : index
    %c0_5 = arith.constant 0 : index
    %6 = vector.load %arg4[%c0_4, %c0_5] : memref<1x512xf32, #tpu.memory_space<vmem>>, vector<1x512xf32>
    %7 = vector.broadcast %6 : vector<1x512xf32> to vector<16x512xf32>
    %8 = arith.addf %5, %7 : vector<16x512xf32>
    %cst_6 = arith.constant 5.000000e-01 : f32
    %9 = vector.broadcast %cst_6 : f32 to vector<16x512xf32>
    %10 = arith.mulf %9, %8 : vector<16x512xf32>
    %cst_7 = arith.constant 4.471500e-02 : f32
    %11 = vector.broadcast %cst_7 : f32 to vector<16x512xf32>
    %12 = arith.mulf %11, %8 : vector<16x512xf32>
    %13 = arith.mulf %12, %8 : vector<16x512xf32>
    %14 = arith.mulf %13, %8 : vector<16x512xf32>
    %15 = arith.addf %8, %14 : vector<16x512xf32>
    %cst_8 = arith.constant 0.797884583 : f32
    %16 = vector.broadcast %cst_8 : f32 to vector<16x512xf32>
    %17 = arith.mulf %16, %15 : vector<16x512xf32>
    %18 = math.tanh %17 : vector<16x512xf32>
    %cst_9 = arith.constant 1.000000e+00 : f32
    %19 = vector.broadcast %cst_9 : f32 to vector<16x512xf32>
    %20 = arith.addf %19, %18 : vector<16x512xf32>
    %21 = arith.mulf %10, %20 : vector<16x512xf32>
    %c0_10 = arith.constant 0 : index
    %c0_11 = arith.constant 0 : index
    %22 = vector.load %arg8[%c0_10, %c0_11] : memref<16x128xf32, #tpu.memory_space<vmem>>, vector<16x128xf32>
    %23 = arith.truncf %21 : vector<16x512xf32> to vector<16x512xbf16>
    %c0_12 = arith.constant 0 : index
    %c0_13 = arith.constant 0 : index
    %24 = vector.load %arg5[%c0_12, %c0_13] : memref<512x128xbf16, #tpu.memory_space<vmem>>, vector<512x128xbf16>
    %cst_14 = arith.constant dense<0.000000e+00> : vector<16x128xf32>
    %25 = tpu.matmul %23, %24, %cst_14 {dimension_numbers = #tpu.dot_dimension_numbers<[1], [0], [0], [1], [0, 0, 1, 1], [], []>} : vector<16x512xbf16>, vector<512x128xbf16>, vector<16x128xf32> -> vector<16x128xf32>
    %26 = arith.addf %22, %25 : vector<16x128xf32>
    %c0_15 = arith.constant 0 : index
    %c0_16 = arith.constant 0 : index
    %27 = vector.load %arg8[%c0_15, %c0_16] : memref<16x128xf32, #tpu.memory_space<vmem>>, vector<16x128xf32>
    tpu.vector_store %arg8[%c0_15, %c0_16], %26 {strides = array<i32>} : memref<16x128xf32, #tpu.memory_space<vmem>>, vector<16x128xf32>,
    %c0_i32_17 = arith.constant 0 : i32
    %28 = arith.cmpi eq, %arg1, %c0_i32_17 : i32
    %29 = arith.extui %28 : i1 to i32
    %c0_i32_18 = arith.constant 0 : i32
    %30 = arith.cmpi ne, %29, %c0_i32_18 : i32
    scf.if %30 {
      %c0_19 = arith.constant 0 : index
      %c0_20 = arith.constant 0 : index
      %31 = vector.load %arg8[%c0_19, %c0_20] : memref<16x128xf32, #tpu.memory_space<vmem>>, vector<16x128xf32>
      %c0_21 = arith.constant 0 : index
      %c0_22 = arith.constant 0 : index
      %32 = vector.load %arg6[%c0_21, %c0_22] : memref<1x128xf32, #tpu.memory_space<vmem>>, vector<1x128xf32>
      %33 = vector.broadcast %32 : vector<1x128xf32> to vector<16x128xf32>
      %34 = arith.addf %31, %33 : vector<16x128xf32>
      %c0_23 = arith.constant 0 : index
      %c0_24 = arith.constant 0 : index
      %35 = vector.load %arg7[%c0_23, %c0_24] : memref<16x128xf32, #tpu.memory_space<vmem>>, vector<16x128xf32>
      tpu.vector_store %arg7[%c0_23, %c0_24], %34 {strides = array<i32>} : memref<16x128xf32, #tpu.memory_space<vmem>>, vector<16x128xf32>,
    } else {
    }
    return
  }
  func.func @transform_0(%arg0: i32, %arg1: i32) -> (i32, i32) {
    %c0_i32 = arith.constant 0 : i32
    %c0_i32_0 = arith.constant 0 : i32
    return %arg0, %c0_i32 : i32, i32
  }
  func.func @transform_1(%arg0: i32, %arg1: i32) -> (i32, i32) {
    %c0_i32 = arith.constant 0 : i32
    %c0_i32_0 = arith.constant 0 : i32
    return %c0_i32, %arg1 : i32, i32
  }
  func.func @transform_2(%arg0: i32, %arg1: i32) -> (i32, i32) {
    %c0_i32 = arith.constant 0 : i32
    %c0_i32_0 = arith.constant 0 : i32
    return %c0_i32, %arg1 : i32, i32
  }
  func.func @transform_3(%arg0: i32, %arg1: i32) -> (i32, i32) {
    %c0_i32 = arith.constant 0 : i32
    %c0_i32_0 = arith.constant 0 : i32
    return %arg1, %c0_i32 : i32, i32
  }
  func.func @transform_4(%arg0: i32, %arg1: i32) -> (i32, i32) {
    %c0_i32 = arith.constant 0 : i32
    %c0_i32_0 = arith.constant 0 : i32
    %c0_i32_1 = arith.constant 0 : i32
    return %c0_i32, %c0_i32_0 : i32, i32
  }
  func.func @transform_5(%arg0: i32, %arg1: i32) -> (i32, i32) {
    %c0_i32 = arith.constant 0 : i32
    %c0_i32_0 = arith.constant 0 : i32
    return %arg0, %c0_i32 : i32, i32
  }
}

</mosaic_0001>

<bundles_post_ra>
// kernel: tpu_custom_call.1
= control target key start
LH: loop header
LB: loop body
LE: loop exit
PB: predicated region body
PF: predicated region fallthrough
CT: control target
= control target key end

     0   :  { %10 = vsyncpa [#allocation4], 0  ;;  %s1356_s0 = inlined_call_operand.hbm [shape: bf16[16,128], index: 0, kind: input, shape index: {}]   ;;  %s1357_s1 = inlined_call_operand.hbm [shape: bf16[128,512], index: 1, kind: input, shape index: {}]   ;;  %s1358_s2 = inlined_call_operand.hbm [shape: f32[1,512], index: 2, kind: input, shape index: {}]   ;;  %s1359_s3 = inlined_call_operand.hbm [shape: bf16[512,128], index: 3, kind: input, shape index: {}]   ;;  %s1360_s4 = inlined_call_operand.vmem [shape: f32[1,128], index: 4, kind: input, shape index: {}]   ;;  %s1361_s5 = inlined_call_operand.hbm [shape: f32[16,128], index: 5, kind: output, shape index: {}]  }
   0x1   :  { %11 = vsyncpa [#allocation7], 0 }
   0x2   :  { %12 = vsyncpa [#allocation10], 0  ;;  %s31_s20 = sshll.u32 %s1357_s1, 4  ;;  %s32_s20 = int_to_ptr.hbm [resolvable:$true] %s31_s20 }
   0x3   :  { %13 = vsyncpa [#allocation5], 0  ;;  %s1263_s21 = smov [#allocation6]   ;;  %s18_s25 = sshll.u32 %s1356_s0, 4  ;;  %s19_s25 = int_to_ptr.hbm [resolvable:$true] %s18_s25 }
   0x4   :  { %s33_s22 = sshll.u32 %s1263_s21, 4  ;;  %s1264_s26 = smov 256   ;;  %s34_s22 = int_to_ptr.vmem [resolvable:$true] %s33_s22 }
   0x5   :  { %s1265_s27 = smov 16   ;;  %s1266_s28 = smov [#allocation3]  }
   0x6   :  { %39 = dma.hbm_to_vmem [thread:$0]  %s32_s20, 4096, %s34_s22, [#allocation7], %s1264_s26, %s1264_s26, %s1265_s27  }
   0x7   :  { %s20_s29 = sshll.u32 %s1266_s28, 4  ;;  %s1267_s30 = smov 64   ;;  %s21_s29 = int_to_ptr.vmem [resolvable:$true] %s20_s29 }
   0x8   :  { %s1268_s6 = smov 4   ;;  %s45_s8 = sshll.u32 %s1358_s2, 4  ;;  %s46_s8 = int_to_ptr.hbm [resolvable:$true] %s45_s8 }
   0x9   :  { %26 = dma.hbm_to_vmem [thread:$0]  %s19_s25, 128, %s21_s29, [#allocation4], %s1267_s30, %s1267_s30, %s1268_s6  }
   0xa   :  { %s1269_s9 = smov [#allocation8]   ;;  %s55_s12 = sshll.u32 %s1359_s3, 4  ;;  %s56_s12 = int_to_ptr.hbm [resolvable:$true] %s55_s12 }
   0xb   :  { %s47_s10 = sshll.u32 %s1269_s9, 4  ;;  %s1270_s13 = smov [#allocation9]   ;;  %s48_s10 = int_to_ptr.vmem [resolvable:$true] %s47_s10 }
   0xc   :  { %50 = dma.hbm_to_vmem [thread:$0]  %s46_s8, 64, %s48_s10, [#allocation7]  }
   0xd   :  { %s57_s14 = sshll.u32 %s1270_s13, 4  ;;  %s58_s14 = int_to_ptr.vmem [resolvable:$true] %s57_s14 }
   0xe   :  { %63 = dma.hbm_to_vmem [thread:$0]  %s56_s12, 4096, %s58_s14, [#allocation10], %s1267_s30, %s1267_s30, %s1268_s6  }
   0xf   :  { %1255 = dma.done.wait [#allocation4], 128  }
  0x10   :  { %1256 = vsyncadd [#allocation4], 4294967168 }
  0x11   :  { %1257 = dma.done.wait [#allocation7], 4160  }
  0x12   :  { %1258 = vsyncadd [#allocation7], 4294963136 }
  0x13   :  { %1259 = dma.done.wait [#allocation10], 4096  }
  0x14   :  { %1260 = vsyncadd [#allocation10], 4294963200  ;;  %v900_v0 = vld [vmem:[#allocation6 + $0xe0] sm:$0xf]  ;;  %v1073_v1 = vld [vmem:[#allocation6 + $0xec] sm:$0xf0] }
  0x15   :  { %v1071_v2 = vld [vmem:[#allocation6 + $0xe4] sm:$0xf]  ;;  %v901_v3 = vor.u32 %v1073_v1, %v900_v0  ;;  %v902_v4 = vld [vmem:[#allocation6 + $0xf0] sm:$0xf0]  ;;  %v908_v5 = vld [vmem:[#allocation6 + $0xe8] sm:$0xf] }
  0x16   :  { %v1074_v6 = vld [vmem:[#allocation6 + $0xf4] sm:$0xf0]  ;;  %v905_v7 = vor.u32 %v1071_v2, %v902_v4  ;;  %v1072_v9 = vld [vmem:[#allocation6 + $0xec] sm:$0xf]  ;;  %v910_v10 = vld [vmem:[#allocation6 + $0xf8] sm:$0xf0] }
  0x17   :  { %v909_v8 = vor.u32 %v1074_v6, %v908_v5  ;;  %v884_v11 = vld [vmem:[#allocation6 + $0xc0] sm:$0xf]  ;;  %298 = vmatpush.bf16.msra.mxu0 %v901_v3  ;;  %v913_v12 = vor.u32 %v1072_v9, %v910_v10  ;;  %v1069_v13 = vld [vmem:[#allocation6 + $0xcc] sm:$0xf0]  ;;  %v1067_v14 = vld [vmem:[#allocation6 + $0xc4] sm:$0xf] }
  0x18   :  { %v886_v15 = vld [vmem:[#allocation6 + $0xd0] sm:$0xf0]  ;;  %312 = vmatpush.bf16.msra.mxu1 %v905_v7  ;;  %v885_v16 = vor.u32 %v1069_v13, %v884_v11  ;;  %v892_v18 = vld [vmem:[#allocation6 + $0xc8] sm:$0xf]  ;;  %v1070_v19 = vld [vmem:[#allocation6 + $0xd4] sm:$0xf0] }
  0x19   :  { %326 = vmatpush.bf16.msra.mxu2 %v909_v8  ;;  %v889_v17 = vor.u32 %v1067_v14, %v886_v15  ;;  %v1068_v20 = vld [vmem:[#allocation6 + $0xcc] sm:$0xf]  ;;  %340 = vmatpush.bf16.msra.mxu3 %v913_v12  ;;  %v893_v21 = vor.u32 %v1070_v19, %v892_v18  ;;  %v894_v22 = vld [vmem:[#allocation6 + $0xd8] sm:$0xf0]  ;;  %v868_v23 = vld [vmem:[#allocation6 + $0xa0] sm:$0xf] }
  0x1a   :  { %v1065_v24 = vld [vmem:[#allocation6 + $0xac] sm:$0xf0]  ;;  %v897_v25 = vor.u32 %v1068_v20, %v894_v22  ;;  %v1063_v26 = vld [vmem:[#allocation6 + $0xa4] sm:$0xf]  ;;  %v870_v27 = vld [vmem:[#allocation6 + $0xb0] sm:$0xf0] }
  0x1b   :  { %v876_v28 = vld [vmem:[#allocation6 + $0xa8] sm:$0xf]  ;;  %299 = vmatpush.bf16.msra.mxu0 %v885_v16  ;;  %v869_v29 = vor.u32 %v1065_v24, %v868_v23  ;;  %v1066_v30 = vld [vmem:[#allocation6 + $0xb4] sm:$0xf0]  ;;  %v1064_v31 = vld [vmem:[#allocation6 + $0xac] sm:$0xf]  ;;  %v873_v33 = vor.u32 %v1063_v26, %v870_v27 }
  0x1c   :  { %v878_v32 = vld [vmem:[#allocation6 + $0xb8] sm:$0xf0]  ;;  %313 = vmatpush.bf16.msra.mxu1 %v889_v17  ;;  %v877_v34 = vor.u32 %v1066_v30, %v876_v28  ;;  %v852_v35 = vld [vmem:[#allocation6 + $0x80] sm:$0xf]  ;;  %v1061_v36 = vld [vmem:[#allocation6 + $0x8c] sm:$0xf0] }
  0x1d   :  { %327 = vmatpush.bf16.msra.mxu2 %v893_v21  ;;  %v1059_v37 = vld [vmem:[#allocation6 + $0x84] sm:$0xf]  ;;  %341 = vmatpush.bf16.msra.mxu3 %v897_v25  ;;  %v881_v38 = vor.u32 %v1064_v31, %v878_v32  ;;  %v854_v39 = vld [vmem:[#allocation6 + $0x90] sm:$0xf0]  ;;  %v860_v40 = vld [vmem:[#allocation6 + $0x88] sm:$0xf]  ;;  %v853_v44 = vor.u32 %v1061_v36, %v852_v35 }
  0x1e   :  { %v1062_v41 = vld [vmem:[#allocation6 + $0x94] sm:$0xf0]  ;;  %v1060_v42 = vld [vmem:[#allocation6 + $0x8c] sm:$0xf]  ;;  %v862_v43 = vld [vmem:[#allocation6 + $0x98] sm:$0xf0]  ;;  %v857_v45 = vor.u32 %v1059_v37, %v854_v39 }
  0x1f   :  { %300 = vmatpush.bf16.msra.mxu0 %v869_v29  ;;  %v861_v46 = vor.u32 %v1062_v41, %v860_v40  ;;  %v836_v47 = vld [vmem:[#allocation6 + $0x60] sm:$0xf]  ;;  %v1057_v48 = vld [vmem:[#allocation6 + $0x6c] sm:$0xf0]  ;;  %v1055_v49 = vld [vmem:[#allocation6 + $0x64] sm:$0xf]  ;;  %v865_v50 = vor.u32 %v1060_v42, %v862_v43 }
  0x20   :  { %314 = vmatpush.bf16.msra.mxu1 %v873_v33  ;;  %v838_v51 = vld [vmem:[#allocation6 + $0x70] sm:$0xf0]  ;;  %v844_v52 = vld [vmem:[#allocation6 + $0x68] sm:$0xf]  ;;  %v1058_v53 = vld [vmem:[#allocation6 + $0x74] sm:$0xf0]  ;;  %v837_v56 = vor.u32 %v1057_v48, %v836_v47 }
  0x21   :  { %328 = vmatpush.bf16.msra.mxu2 %v877_v34  ;;  %342 = vmatpush.bf16.msra.mxu3 %v881_v38  ;;  %v1056_v54 = vld [vmem:[#allocation6 + $0x6c] sm:$0xf]  ;;  %v846_v55 = vld [vmem:[#allocation6 + $0x78] sm:$0xf0]  ;;  %v841_v57 = vor.u32 %v1055_v49, %v838_v51  ;;  %v845_v58 = vor.u32 %v1058_v53, %v844_v52  ;;  %v820_v59 = vld [vmem:[#allocation6 + $0x40] sm:$0xf] }
  0x22   :  { %v1053_v60 = vld [vmem:[#allocation6 + $0x4c] sm:$0xf0]  ;;  %v1051_v61 = vld [vmem:[#allocation6 + $0x44] sm:$0xf]  ;;  %v849_v62 = vor.u32 %v1056_v54, %v846_v55  ;;  %v822_v63 = vld [vmem:[#allocation6 + $0x50] sm:$0xf0] }
  0x23   :  { %301 = vmatpush.bf16.msra.mxu0 %v853_v44  ;;  %v828_v0 = vld [vmem:[#allocation6 + $0x48] sm:$0xf]  ;;  %v1054_v1 = vld [vmem:[#allocation6 + $0x54] sm:$0xf0]  ;;  %v1052_v2 = vld [vmem:[#allocation6 + $0x4c] sm:$0xf]  ;;  %v821_v4 = vor.u32 %v1053_v60, %v820_v59  ;;  %v825_v5 = vor.u32 %v1051_v61, %v822_v63 }
  0x24   :  { %315 = vmatpush.bf16.msra.mxu1 %v857_v45  ;;  %v830_v3 = vld [vmem:[#allocation6 + $0x58] sm:$0xf0]  ;;  %v829_v6 = vor.u32 %v1054_v1, %v828_v0  ;;  %v804_v7 = vld [vmem:[#allocation6 + $0x20] sm:$0xf]  ;;  %v1049_v8 = vld [vmem:[#allocation6 + $0x2c] sm:$0xf0] }
  0x25   :  { %329 = vmatpush.bf16.msra.mxu2 %v861_v46  ;;  %343 = vmatpush.bf16.msra.mxu3 %v865_v50  ;;  %v1047_v9 = vld [vmem:[#allocation6 + $0x24] sm:$0xf]  ;;  %v833_v10 = vor.u32 %v1052_v2, %v830_v3  ;;  %v806_v11 = vld [vmem:[#allocation6 + $0x30] sm:$0xf0]  ;;  %v812_v12 = vld [vmem:[#allocation6 + $0x28] sm:$0xf]  ;;  %v805_v16 = vor.u32 %v1049_v8, %v804_v7 }
  0x26   :  { %v1050_v13 = vld [vmem:[#allocation6 + $0x34] sm:$0xf0]  ;;  %v1048_v14 = vld [vmem:[#allocation6 + $0x2c] sm:$0xf]  ;;  %v814_v15 = vld [vmem:[#allocation6 + $0x38] sm:$0xf0]  ;;  %v809_v17 = vor.u32 %v1047_v9, %v806_v11 }
  0x27   :  { %302 = vmatpush.bf16.msra.mxu0 %v837_v56  ;;  %v813_v18 = vor.u32 %v1050_v13, %v812_v12  ;;  %v788_v19 = vld [vmem:[#allocation6] sm:$0xf]  ;;  %v1045_v20 = vld [vmem:[#allocation6 + $0xc] sm:$0xf0]  ;;  %v1043_v21 = vld [vmem:[#allocation6 + $0x4] sm:$0xf]  ;;  %v817_v22 = vor.u32 %v1048_v14, %v814_v15 }
  0x28   :  { %316 = vmatpush.bf16.msra.mxu1 %v841_v57  ;;  %v790_v23 = vld [vmem:[#allocation6 + $0x10] sm:$0xf0]  ;;  %v796_v24 = vld [vmem:[#allocation6 + $0x8] sm:$0xf]  ;;  %v1046_v25 = vld [vmem:[#allocation6 + $0x14] sm:$0xf0]  ;;  %v789_v28 = vor.u32 %v1045_v20, %v788_v19 }
  0x29   :  { %330 = vmatpush.bf16.msra.mxu2 %v845_v58  ;;  %344 = vmatpush.bf16.msra.mxu3 %v849_v62  ;;  %v1044_v26 = vld [vmem:[#allocation6 + $0xc] sm:$0xf]  ;;  %v798_v27 = vld [vmem:[#allocation6 + $0x18] sm:$0xf0]  ;;  %v793_v29 = vor.u32 %v1043_v21, %v790_v23  ;;  %v797_v30 = vor.u32 %v1046_v25, %v796_v24  ;;  %v1081_v35 = vld [vmem:[#allocation9 + $0x30] sm:$0xff]  ;;  %s1271_s15 = smov [#allocation11]  }
  0x2a   :  { %v801_v31 = vor.u32 %v1044_v26, %v798_v27  ;;  %v1042_v32 = vld [vmem:[#allocation3] sm:$0xff]  ;;  %v1080_v39 = vld [vmem:[#allocation9 + $0x28] sm:$0xff]  ;;  %v1079_v43 = vld [vmem:[#allocation9 + $0x20] sm:$0xff]  ;;  %s765_s16 = sshll.u32 %s1271_s15, 4  ;;  %s767_s19 = sshll.u32 %s1361_s5, 4  ;;  %s766_s16 = int_to_ptr.vmem [resolvable:$true] %s765_s16  ;;  %s768_s19 = int_to_ptr.hbm [resolvable:$true] %s767_s19 }
  0x2b   :  { %303 = vmatpush.bf16.msra.mxu0 %v821_v4  ;;  %v1082_v33 = vld [vmem:[#allocation9 + $0x38] sm:$0xff]  ;;  %v1089_v36 = vld [vmem:[#allocation9 + $0x70] sm:$0xff]  ;;  %v1088_v40 = vld [vmem:[#allocation9 + $0x68] sm:$0xff]  ;;  %s1273_s20 = smov 8  }
  0x2c   :  { %317 = vmatpush.bf16.msra.mxu1 %v825_v5  ;;  %v1090_v34 = vld [vmem:[#allocation9 + $0x78] sm:$0xff]  ;;  %v1097_v41 = vld [vmem:[#allocation9 + $0xb0] sm:$0xff]  ;;  %v1087_v44 = vld [vmem:[#allocation9 + $0x60] sm:$0xff] }
  0x2d   :  { %331 = vmatpush.bf16.msra.mxu2 %v829_v6  ;;  %345 = vmatpush.bf16.msra.mxu3 %v833_v10  ;;  %v1098_v37 = vld [vmem:[#allocation9 + $0xb8] sm:$0xff]  ;;  %v1105_v42 = vld [vmem:[#allocation9 + $0xf0] sm:$0xff]  ;;  %v1096_v45 = vld [vmem:[#allocation9 + $0xa8] sm:$0xff] }
  0x2e   :  { %v1106_v38 = vld [vmem:[#allocation9 + $0xf8] sm:$0xff]  ;;  %v1104_v46 = vld [vmem:[#allocation9 + $0xe8] sm:$0xff]  ;;  %v1095_v49 = vld [vmem:[#allocation9 + $0xa0] sm:$0xff] }
  0x2f   :  { %304 = vmatpush.bf16.msra.mxu0 %v805_v16  ;;  %v1078_v47 = vld [vmem:[#allocation9 + $0x18] sm:$0xff]  ;;  %v1103_v50 = vld [vmem:[#allocation9 + $0xe0] sm:$0xff]  ;;  %v1077_v51 = vld [vmem:[#allocation9 + $0x10] sm:$0xff] }
  0x30   :  { %318 = vmatpush.bf16.msra.mxu1 %v809_v17  ;;  %v1086_v48 = vld [vmem:[#allocation9 + $0x58] sm:$0xff]  ;;  %v1085_v52 = vld [vmem:[#allocation9 + $0x50] sm:$0xff]  ;;  %v1076_v55 = vld [vmem:[#allocation9 + $0x8] sm:$0xff] }
  0x31   :  { %332 = vmatpush.bf16.msra.mxu2 %v813_v18  ;;  %346 = vmatpush.bf16.msra.mxu3 %v817_v22  ;;  %v1094_v53 = vld [vmem:[#allocation9 + $0x98] sm:$0xff]  ;;  %v1084_v56 = vld [vmem:[#allocation9 + $0x48] sm:$0xff]  ;;  %v1093_v58 = vld [vmem:[#allocation9 + $0x90] sm:$0xff] }
  0x32   :  { %v1102_v54 = vld [vmem:[#allocation9 + $0xd8] sm:$0xff]  ;;  %v1101_v59 = vld [vmem:[#allocation9 + $0xd0] sm:$0xff]  ;;  %v1075_v61 = vld [vmem:[#allocation9] sm:$0xff] }
  0x33   :  { %305 = vmatpush.bf16.msra.mxu0 %v789_v28  ;;  %v1316_v57 = vld [vmem:[#allocation8] sm:$0xf]  ;;  %v1083_v62 = vld [vmem:[#allocation9 + $0x40] sm:$0xff]  ;;  %v1092_v0 = vld [vmem:[#allocation9 + $0x88] sm:$0xff] }
  0x34   :  { %319 = vmatpush.bf16.msra.mxu1 %v793_v29  ;;  %v124_v60 = vperm.slane %v1316_v57, 0  ;;  %v125_v63 = vperm.slane %v1316_v57, 1  ;;  %v1100_v1 = vld [vmem:[#allocation9 + $0xc8] sm:$0xff]  ;;  %v1091_v7 = vld [vmem:[#allocation9 + $0x80] sm:$0xff]  ;;  %v126_v10 = vperm.slane %v1316_v57, 2  ;;  %v127_v12 = vperm.slane %v1316_v57, 3 }
  0x35   :  { %333 = vmatpush.bf16.msra.mxu2 %v797_v30  ;;  %347 = vmatpush.bf16.msra.mxu3 %v801_v31  ;;  %v1099_v8 = vld [vmem:[#allocation9 + $0xc0] sm:$0xff] }
  0x36   :  { %306 = vmatmul.bf16.vlgmr.msra.gmra.mxu0 %v1042_v32 }
  0x37   :  { %320 = vmatmul.bf16.vlgmr.msra.gmra.mxu1 %v1042_v32  ;;  %688 = vmatpush.bf16.msrb.mxu0 %v1082_v33 }
  0x38   :  { %334 = vmatmul.bf16.vlgmr.msra.gmra.mxu2 %v1042_v32  ;;  %348 = vmatmul.bf16.vlgmr.msra.gmra.mxu3 %v1042_v32 }
  0x39   :  { %702 = vmatpush.bf16.msrb.mxu1 %v1090_v34  ;;  %716 = vmatpush.bf16.msrb.mxu2 %v1098_v37 }
  0x3a   :  { %730 = vmatpush.bf16.msrb.mxu3 %v1106_v38 }
  0x3b   :  { %689 = vmatpush.bf16.msrb.mxu0 %v1081_v35 }
  0x3d   :  { %703 = vmatpush.bf16.msrb.mxu1 %v1089_v36  ;;  %717 = vmatpush.bf16.msrb.mxu2 %v1097_v41 }
  0x3e   :  { %731 = vmatpush.bf16.msrb.mxu3 %v1105_v42 }
  0x3f   :  { %690 = vmatpush.bf16.msrb.mxu0 %v1080_v39 }
  0x41   :  { %704 = vmatpush.bf16.msrb.mxu1 %v1088_v40  ;;  %718 = vmatpush.bf16.msrb.mxu2 %v1096_v45 }
  0x42   :  { %732 = vmatpush.bf16.msrb.mxu3 %v1104_v46 }
  0x43   :  { %691 = vmatpush.bf16.msrb.mxu0 %v1079_v43 }
  0x45   :  { %705 = vmatpush.bf16.msrb.mxu1 %v1087_v44  ;;  %719 = vmatpush.bf16.msrb.mxu2 %v1095_v49 }
  0x46   :  { %733 = vmatpush.bf16.msrb.mxu3 %v1103_v50 }
  0x47   :  { %692 = vmatpush.bf16.msrb.mxu0 %v1078_v47 }
  0x49   :  { %706 = vmatpush.bf16.msrb.mxu1 %v1086_v48  ;;  %720 = vmatpush.bf16.msrb.mxu2 %v1094_v53 }
  0x4a   :  { %734 = vmatpush.bf16.msrb.mxu3 %v1102_v54 }
  0x4b   :  { %693 = vmatpush.bf16.msrb.mxu0 %v1077_v51 }
  0x4d   :  { %707 = vmatpush.bf16.msrb.mxu1 %v1085_v52  ;;  %721 = vmatpush.bf16.msrb.mxu2 %v1093_v58 }
  0x4e   :  { %735 = vmatpush.bf16.msrb.mxu3 %v1101_v59 }
  0x4f   :  { %694 = vmatpush.bf16.msrb.mxu0 %v1076_v55 }
  0x51   :  { %708 = vmatpush.bf16.msrb.mxu1 %v1084_v56  ;;  %722 = vmatpush.bf16.msrb.mxu2 %v1092_v0 }
  0x52   :  { %736 = vmatpush.bf16.msrb.mxu3 %v1100_v1 }
  0x53   :  { %695 = vmatpush.bf16.msrb.mxu0 %v1075_v61 }
  0x55   :  { %709 = vmatpush.bf16.msrb.mxu1 %v1083_v62  ;;  %723 = vmatpush.bf16.msrb.mxu2 %v1091_v7 }
  0x56   :  { %737 = vmatpush.bf16.msrb.mxu3 %v1099_v8 }
  0xb3   :  { %v307_v2 = vpop.f32.mrf.mxu0 }
  0xb4   :  { %v1320_v3 = vadd.f32 %v307_v2, %v124_v60  ;;  %v321_v4 = vpop.f32.mrf.mxu1 }
  0xb5   :  { %v1322_v5 = vadd.f32 %v321_v4, %v125_v63 }
  0xb6   :  { %v362_v6 = vmul.f32 0.044715, %v1320_v3 }
  0xb7   :  { %v363_v9 = vmul.f32 0.044715, %v1322_v5 }
  0xb8   :  { %v370_v11 = vmul.f32 %v362_v6, %v1320_v3  ;;  %v354_v6 = vmul.f32 0.5, %v1320_v3 }
  0xb9   :  { %v371_v13 = vmul.f32 %v363_v9, %v1322_v5  ;;  %v355_v9 = vmul.f32 0.5, %v1322_v5 }
  0xba   :  { %v378_v15 = vmul.f32 %v370_v11, %v1320_v3 }
  0xbb   :  { %v335_v14 = vpop.f32.mrf.mxu2  ;;  %v349_v17 = vpop.f32.mrf.mxu3  ;;  %v379_v19 = vmul.f32 %v371_v13, %v1322_v5 }
  0xbc   :  { %v1331_v16 = vadd.f32 %v335_v14, %v126_v10  ;;  %v309_v18 = vpop.f32.mrf.mxu0  ;;  %v1334_v20 = vadd.f32 %v349_v17, %v127_v12  ;;  %v323_v22 = vpop.f32.mrf.mxu1  ;;  %v386_v23 = vadd.f32 %v378_v15, %v1320_v3 }
  0xbd   :  { %v310_v21 = vadd.f32 %v309_v18, %v124_v60  ;;  %v324_v25 = vadd.f32 %v323_v22, %v125_v63  ;;  %v387_v26 = vadd.f32 %v379_v19, %v1322_v5 }
  0xbe   :  { %v364_v24 = vmul.f32 0.044715, %v1331_v16  ;;  %v365_v27 = vmul.f32 0.044715, %v1334_v20  ;;  %v394_v33 = vmul.f32 0.7978846, %v386_v23 }
  0xbf   :  { %v366_v28 = vmul.f32 0.044715, %v310_v21  ;;  %v367_v30 = vmul.f32 0.044715, %v324_v25  ;;  %v395_v35 = vmul.f32 0.7978846, %v387_v26 }
  0xc0   :  { %v372_v29 = vmul.f32 %v364_v24, %v1331_v16  ;;  %v373_v31 = vmul.f32 %v365_v27, %v1334_v20  ;;  %1119 = vtanh.f32 %v394_v33  ;;  %v358_v7 = vmul.f32 0.5, %v310_v21 }
  0xc1   :  { %v374_v32 = vmul.f32 %v366_v28, %v310_v21  ;;  %v375_v34 = vmul.f32 %v367_v30, %v324_v25  ;;  %1121 = vtanh.f32 %v395_v35  ;;  %v356_v26 = vmul.f32 0.5, %v1331_v16 }
  0xc2   :  { %v380_v36 = vmul.f32 %v372_v29, %v1331_v16  ;;  %v381_v39 = vmul.f32 %v373_v31, %v1334_v20  ;;  %v357_v27 = vmul.f32 0.5, %v1334_v20 }
  0xc3   :  { %v337_v37 = vpop.f32.mrf.mxu2  ;;  %v382_v38 = vmul.f32 %v374_v32, %v310_v21  ;;  %v351_v41 = vpop.f32.mrf.mxu3  ;;  %v383_v42 = vmul.f32 %v375_v34, %v324_v25 }
  0xc4   :  { %v338_v40 = vadd.f32 %v337_v37, %v126_v10  ;;  %v388_v43 = vadd.f32 %v380_v36, %v1331_v16  ;;  %v352_v44 = vadd.f32 %v351_v41, %v127_v12  ;;  %v389_v46 = vadd.f32 %v381_v39, %v1334_v20  ;;  %v1118_v20 = vld [vmem:[%s1360_s4] ss:$0 sm:$0xff]  ;;  %s1272_s4 = smov 128  }
  0xc5   :  { %v390_v45 = vadd.f32 %v382_v38, %v310_v21  ;;  %v391_v48 = vadd.f32 %v383_v42, %v324_v25  ;;  %v359_v10 = vmul.f32 0.5, %v324_v25 }
  0xc6   :  { %v368_v47 = vmul.f32 0.044715, %v338_v40  ;;  %v369_v49 = vmul.f32 0.044715, %v352_v44  ;;  %v396_v53 = vmul.f32 0.7978846, %v388_v43  ;;  %v1120_v57 = vpop.eup %1119 }
  0xc7   :  { %v398_v50 = vmul.f32 0.7978846, %v390_v45  ;;  %v399_v52 = vmul.f32 0.7978846, %v391_v48  ;;  %v397_v55 = vmul.f32 0.7978846, %v389_v46  ;;  %v1122_v59 = vpop.eup %1121 }
  0xc8   :  { %v376_v51 = vmul.f32 %v368_v47, %v338_v40  ;;  %v377_v54 = vmul.f32 %v369_v49, %v352_v44  ;;  %v410_v62 = vadd.f32 1.0, %v1120_v57  ;;  %v411_v1 = vadd.f32 1.0, %v1122_v59 }
  0xc9   :  { %1123 = vtanh.f32 %v398_v50  ;;  %v360_v5 = vmul.f32 0.5, %v338_v40  ;;  %v361_v28 = vmul.f32 0.5, %v352_v44 }
  0xca   :  { %1125 = vtanh.f32 %v399_v52  ;;  %v384_v56 = vmul.f32 %v376_v51, %v338_v40  ;;  %v385_v58 = vmul.f32 %v377_v54, %v352_v44  ;;  %v418_v13 = vmul.f32 %v410_v62, %v354_v6 }
  0xcb   :  { %1127 = vtanh.f32 %v396_v53  ;;  %v419_v17 = vmul.f32 %v411_v1, %v355_v9 }
  0xcc   :  { %v392_v60 = vadd.f32 %v384_v56, %v338_v40  ;;  %v393_v61 = vadd.f32 %v385_v58, %v352_v44  ;;  %1129 = vtanh.f32 %v397_v55 }
  0xce   :  { %v400_v63 = vmul.f32 0.7978846, %v392_v60  ;;  %v401_v2 = vmul.f32 0.7978846, %v393_v61 }
  0xcf   :  { %v1124_v0 = vpop.eup %1123 }
  0xd0   :  { %v1126_v4 = vpop.eup %1125  ;;  %v414_v8 = vadd.f32 1.0, %v1124_v0  ;;  %1131 = vtanh.f32 %v400_v63 }
  0xd1   :  { %v415_v11 = vadd.f32 1.0, %v1126_v4  ;;  %1133 = vtanh.f32 %v401_v2  ;;  %v1128_v12 = vpop.eup %1127 }
  0xd2   :  { %v422_v14 = vmul.f32 %v414_v8, %v358_v7  ;;  %v1130_v15 = vpop.eup %1129  ;;  %v412_v23 = vadd.f32 1.0, %v1128_v12 }
  0xd3   :  { %v423_v18 = vmul.f32 %v415_v11, %v359_v10  ;;  %v413_v3 = vadd.f32 1.0, %v1130_v15 }
  0xd4   :  { %v428_v19 = vpack.c.bf16 %v422_v14, %v418_v13  ;;  %v420_v30 = vmul.f32 %v412_v23, %v356_v26 }
  0xd5   :  { %v429_v22 = vpack.c.bf16 %v423_v18, %v419_v17  ;;  %v421_v32 = vmul.f32 %v413_v3, %v357_v27 }
  0xd6   :  { %v1132_v24 = vpop.eup %1131  ;;  %696 = vmatmul.bf16.vlgmr.msrb.gmra.mxu0 %v428_v19 }
  0xd7   :  { %v1134_v21 = vpop.eup %1133  ;;  %710 = vmatmul.bf16.vlgmr.msrb.gmra.mxu1 %v429_v22  ;;  %v416_v25 = vadd.f32 1.0, %v1132_v24 }
  0xd8   :  { %v417_v29 = vadd.f32 1.0, %v1134_v21 }
  0xd9   :  { %v424_v31 = vmul.f32 %v416_v25, %v360_v5 }
  0xda   :  { %v425_v33 = vmul.f32 %v417_v29, %v361_v28 }
  0xdb   :  { %v430_v34 = vpack.c.bf16 %v424_v31, %v420_v30 }
  0xdc   :  { %v431_v35 = vpack.c.bf16 %v425_v33, %v421_v32 }
  0xdd   :  { %724 = vmatmul.bf16.vlgmr.msrb.gmra.mxu2 %v430_v34 }
  0xde   :  { %738 = vmatmul.bf16.vlgmr.msrb.gmra.mxu3 %v431_v35 }
 0x153   :  { %v697_v36 = vpop.f32.mrf.mxu0 }
 0x154   :  { %v711_v37 = vpop.f32.mrf.mxu1 }
 0x155   :  { %v712_v38 = vadd.f32 %v711_v37, %v697_v36 }
 0x15b   :  { %v699_v42 = vpop.f32.mrf.mxu0 }
 0x15c   :  { %v713_v43 = vpop.f32.mrf.mxu1 }
 0x15d   :  { %v714_v45 = vadd.f32 %v713_v43, %v699_v42 }
 0x160   :  { %v725_v39 = vpop.f32.mrf.mxu2 }
 0x161   :  { %v726_v41 = vadd.f32 %v725_v39, %v712_v38  ;;  %v739_v16 = vpop.f32.mrf.mxu3 }
 0x163   :  { %v740_v40 = vadd.f32 %v739_v16, %v726_v41 }
 0x165   :  { %v757_v44 = vadd.f32 %v1118_v20, %v740_v40 }
 0x167   :  { %759 = vst [vmem:[#allocation11] sm:$0xff] %v757_v44 }
 0x168   :  { %v727_v46 = vpop.f32.mrf.mxu2 }
 0x169   :  { %v728_v47 = vadd.f32 %v727_v46, %v714_v45  ;;  %v741_v48 = vpop.f32.mrf.mxu3 }
 0x16b   :  { %v742_v49 = vadd.f32 %v741_v48, %v728_v47 }
 0x16d   :  { %v758_v50 = vadd.f32 %v1118_v20, %v742_v49 }
 0x16f   :  { %760 = vst [vmem:[#allocation11 + $0x8] sm:$0xff] %v758_v50 }
 0x170   :  { %773 = dma.vmem_to_hbm [thread:$0]  %s766_s16, 256, %s768_s19, [#allocation5], %s1272_s4, %s1272_s4, %s1273_s20  }
 0x171   :  { %1261 = dma.done.wait [#allocation5], 256  }
 0x172   :  { %1262 = vsyncadd [#allocation5], 4294967040 }
 0x173   :  { %778 = vsyncpa [#allocation4], 1 }
 0x174   :  { %779 = vsyncpa [#allocation7], 1 }
 0x175   :  { %780 = vsyncpa [#allocation10], 1 }
 0x176   :  { %781 = vsyncpa [#allocation5], 1 }

</bundles_post_ra>
